<compile_context>
chip_gen: v6e
topology: v6e:2x2x1
jax: 0.10.0
libtpu: 0.0.40
codegen_flags: <defaults>
</compile_context>

<pallas_src>
import functools

import jax
import jax.numpy as jnp
from jax.experimental import pallas as pl
from jax.experimental.pallas import tpu as pltpu


def _dice_sums_kernel(logits_ref, labels_ref, out_ref, inter_acc, card_acc,
                      *, hw, tn, tiles_per_part):
    p = pl.program_id(0)   # partial index (pixel-range split; megacore axis)
    b = pl.program_id(1)   # batch index
    t = pl.program_id(2)   # pixel-tile index within this partial

    # Zero the lane-partial accumulators at the start of each partial sweep.
    @pl.when(jnp.logical_and(b == 0, t == 0))
    def _():
        inter_acc[...] = jnp.zeros_like(inter_acc)
        card_acc[...] = jnp.zeros_like(card_acc)

    x = logits_ref[...].astype(jnp.float32)        # (C, TN)  classes on sublanes
    lab = labels_ref[...]                           # (1, TN)  int32
    cls = jax.lax.broadcasted_iota(jnp.int32, x.shape, 0)   # (C, TN)

    # Numerically-stable softmax over the class (sublane) axis.
    m = jnp.max(x, axis=0, keepdims=True)           # (1, TN)  XLU
    e = jnp.exp(x - m)                               # (C, TN)  EUP
    denom = jnp.sum(e, axis=0, keepdims=True)        # (1, TN)  XLU
    prob = e * pl.reciprocal(denom, approx=True)     # divide -> EUP slot
    is_lab = cls == lab                               # single compare, reused

    tile_idx = p * tiles_per_part + t
    is_full = (tile_idx + 1) * tn <= hw               # scalar: no masking needed

    # Fast path: fully-valid tile (>99% of steps) — no validity mask at all.
    @pl.when(is_full)
    def _():
        inter_acc[...] += jnp.where(is_lab, prob, 0.0)
        card_acc[...] += jnp.where(is_lab, prob + 1.0, prob)

    # Slow path: ragged last tile or a clamped duplicate tile — mask invalid
    # lanes (also sanitizes possible NaN/Inf garbage in the padded lanes).
    @pl.when(jnp.logical_not(is_full))
    def _():
        col = jax.lax.broadcasted_iota(jnp.int32, (1, tn), 1)
        valid = (tile_idx * tn + col) < hw            # (1, TN) bool
        prob_m = jnp.where(valid, prob, 0.0)
        sel = jnp.logical_and(valid, is_lab)
        inter_acc[...] += jnp.where(sel, prob_m, 0.0)
        card_acc[...] += jnp.where(sel, prob_m + 1.0, prob_m)

    # Single cross-lane reduce + output store at the end of this partial sweep.
    @pl.when(jnp.logical_and(b == pl.num_programs(1) - 1,
                             t == pl.num_programs(2) - 1))
    def _():
        out_ref[:, 0:1] = jnp.sum(inter_acc[...], axis=1, keepdims=True)  # (C, 1)
        out_ref[:, 1:2] = jnp.sum(card_acc[...], axis=1, keepdims=True)   # (C, 1)


def _tpu_vmem_bytes():
    try:
        return int(pltpu.get_tpu_info().vmem_capacity_bytes)
    except Exception:
        return 64 * 1024 * 1024        # v7x has the smallest VMEM; be conservative


def _num_tensorcores():
    """Best-effort TensorCore-per-chip detection (2 on v7x, 1 on v5e/v6e)."""
    try:
        info = pltpu.get_tpu_info()
        for attr in ("num_cores", "core_count", "num_tensorcores",
                     "tensorcores_per_chip", "num_tensor_cores"):
            v = getattr(info, attr, None)
            if v:
                return max(1, int(v))
    except Exception:
        pass
    return 1


def dice_loss_pallas(logits, target, eps=1e-7, tn=None, num_partials=None):
    """logits: [B, C, H, W] float (f32 or bf16 — bf16 preferred on v5e/v6e,
    kernel upcasts in-register); target: [B, 1, H, W] integer labels.

    tn: pixels per grid step (lane tile). Default scales with C so each grid
        step carries ~512K elements (amortizes per-step overhead), clamped by a
        per-generation VMEM budget.
    num_partials: leading "parallel" grid axis, default = detected TensorCore
        count (2 on v7x, 1 on v5e/v6e), clamped to the number of pixel tiles.
    """
    B, C, H, W = logits.shape
    HW = H * W

    # Zero-copy channels-first views (no transpose, no pad, no upcast in HBM).
    logits3d = logits.reshape(B, C, HW)
    labels3d = target.reshape(B, 1, HW)
    if labels3d.dtype != jnp.int32:
        labels3d = labels3d.astype(jnp.int32)

    # --- tile sizing + explicit VMEM budget (per perf review) ---------------
    itemsize = logits.dtype.itemsize
    phys_vmem = _tpu_vmem_bytes()
    # Explicit scoped limit (v5e default is only 16 MiB); keep ~25% headroom
    # below physical so double-buffering / compiler temporaries always fit.
    vmem_limit = min((phys_vmem * 3) // 4, 96 * 1024 * 1024)

    if tn is None:
        target_elems = 512 * 1024                 # C * tn per step
        tn = max(128, min(target_elems // max(C, 1), 64 * 1024))
    # Per-lane VMEM cost: double-buffered logits + double-buffered labels +
    # two f32 scratch accumulators + ~4 f32 in-kernel temporaries per class.
    bytes_per_lane = C * (2 * itemsize + 2 * 4 + 4 * 4) + 2 * 4
    tn_budget = int(0.6 * vmem_limit) // bytes_per_lane
    tn = min(tn, max(128, tn_budget))

    if HW <= tn:
        tn = HW                               # single full-width tile (always legal)
    else:
        tn = max(128, (tn // 128) * 128)      # lane tiles must be multiples of 128

    tiles = pl.cdiv(HW, tn)
    if num_partials is None:
        num_partials = _num_tensorcores()
    P = max(1, min(num_partials, tiles))      # no duplicated steps on 1-TC chips
    tiles_per_part = pl.cdiv(tiles, P)

    def data_map(p, b, t):
        # Clamp so over-allocated tiles (ragged split) never index past the
        # array; their contribution is masked to zero inside the kernel.
        return (b, 0, jnp.minimum(p * tiles_per_part + t, tiles - 1))

    def out_map(p, b, t):
        return (p, 0, 0)

    kernel = functools.partial(_dice_sums_kernel, hw=HW, tn=tn,
                               tiles_per_part=tiles_per_part)

    sums = pl.pallas_call(
        kernel,
        out_shape=jax.ShapeDtypeStruct((P, C, 2), jnp.float32),
        grid_spec=pltpu.PrefetchScalarGridSpec(
            num_scalar_prefetch=0,
            grid=(P, B, tiles_per_part),
            in_specs=[
                # NOTE: with the larger tn, per-step DMA is >= 0.5-1 MiB and
                # double-buffering hides latency; only add Buffered(3) if
                # xprof shows exposed DMA (and never when HBM-bound).
                pl.BlockSpec((None, C, tn), data_map),   # logits tile, (C, TN)
                pl.BlockSpec((None, 1, tn), data_map),   # labels tile, (1, TN)
            ],
            out_specs=pl.BlockSpec((None, C, 2), out_map),  # per-partial sums
            scratch_shapes=[
                pltpu.VMEM((C, tn), jnp.float32),   # intersection lane-partials
                pltpu.VMEM((C, tn), jnp.float32),   # cardinality lane-partials
            ],
        ),
        compiler_params=pltpu.CompilerParams(
            dimension_semantics=("parallel", "arbitrary", "arbitrary"),
            vmem_limit_bytes=vmem_limit),
    )(logits3d, labels3d)

    partials = jnp.sum(sums, axis=0)          # (C, 2)
    intersection = partials[:, 0]
    cardinality = partials[:, 1]
    dice = jnp.mean(2.0 * intersection / (cardinality + eps))
    return 1.0 - dice


def dice_loss_ref(logits, target, eps=1e-7):
    """Pure-JAX reference mirroring the PyTorch multi-class branch."""
    C = logits.shape[1]
    probas = jax.nn.softmax(logits.astype(jnp.float32), axis=1)
    one_hot = jax.nn.one_hot(target[:, 0], C, dtype=jnp.float32)   # B,H,W,C
    one_hot = jnp.transpose(one_hot, (0, 3, 1, 2))                  # B,C,H,W
    dims = (0, 2, 3)
    inter = jnp.sum(probas * one_hot, dims)
    card = jnp.sum(probas + one_hot, dims)
    return 1.0 - jnp.mean(2.0 * inter / (card + eps))


if __name__ == "__main__":
    key = jax.random.PRNGKey(0)
    k1, k2 = jax.random.split(key)

    B, C, H, W = 2, 4, 16, 16
    logits = jax.random.normal(k1, (B, C, H, W), dtype=jnp.float32)
    target = jax.random.randint(k2, (B, 1, H, W), 0, C, dtype=jnp.int32)

    loss = dice_loss_pallas(logits, target)
    loss = jax.block_until_ready(loss)

    ref = jax.block_until_ready(dice_loss_ref(logits, target))
    # approx reciprocal in the kernel's softmax -> compare at 1e-3.
    assert jnp.allclose(loss, ref, atol=1e-3, rtol=1e-3), (loss, ref)

    print("KERNEL_OK")
</pallas_src>

<mosaic_0001>
module attributes {stable_mosaic.version = 11 : i64} {
  func.func @_dice_sums_kernel(%arg0: i32, %arg1: i32, %arg2: i32, %arg3: memref<1x4x256xf32, #tpu.memory_space<vmem>>, %arg4: memref<1x1x256xi32, #tpu.memory_space<vmem>>, %arg5: memref<1x4x2xf32, #tpu.memory_space<vmem>>, %arg6: memref<4x256xf32, #tpu.memory_space<vmem>>, %arg7: memref<4x256xf32, #tpu.memory_space<vmem>>) attributes {dimension_semantics = [#tpu.dimension_semantics<parallel>, #tpu.dimension_semantics<arbitrary>, #tpu.dimension_semantics<arbitrary>], iteration_bounds = array<i64: 1, 2, 1>, scalar_prefetch = 0 : i64, scratch_operands = 2 : i64, tpu.core_type = #tpu.core_type<tc>, window_params = [{transform_indices = @transform_0, window_bounds = array<i64: 1, 4, 256>}, {transform_indices = @transform_1, window_bounds = array<i64: 1, 1, 256>}, {transform_indices = @transform_2, window_bounds = array<i64: 1, 4, 2>}]} {
    %c0_i32 = arith.constant 0 : i32
    %0 = arith.cmpi eq, %arg1, %c0_i32 : i32
    %c0_i32_0 = arith.constant 0 : i32
    %1 = arith.cmpi eq, %arg2, %c0_i32_0 : i32
    %2 = arith.andi %0, %1 : i1
    %3 = arith.extui %2 : i1 to i32
    %c0_i32_1 = arith.constant 0 : i32
    %4 = arith.cmpi ne, %3, %c0_i32_1 : i32
    scf.if %4 {
      %cst_15 = arith.constant 0.000000e+00 : f32
      %37 = vector.broadcast %cst_15 : f32 to vector<4x256xf32>
      %c0_16 = arith.constant 0 : index
      %c0_17 = arith.constant 0 : index
      %38 = vector.load %arg6[%c0_16, %c0_17] : memref<4x256xf32, #tpu.memory_space<vmem>>, vector<4x256xf32>
      tpu.vector_store %arg6[%c0_16, %c0_17], %37 {strides = array<i32>} : memref<4x256xf32, #tpu.memory_space<vmem>>, vector<4x256xf32>,
      %cst_18 = arith.constant 0.000000e+00 : f32
      %39 = vector.broadcast %cst_18 : f32 to vector<4x256xf32>
      %c0_19 = arith.constant 0 : index
      %c0_20 = arith.constant 0 : index
      %40 = vector.load %arg7[%c0_19, %c0_20] : memref<4x256xf32, #tpu.memory_space<vmem>>, vector<4x256xf32>
      tpu.vector_store %arg7[%c0_19, %c0_20], %39 {strides = array<i32>} : memref<4x256xf32, #tpu.memory_space<vmem>>, vector<4x256xf32>,
    } else {
    }
    %c0 = arith.constant 0 : index
    %c0_2 = arith.constant 0 : index
    %c0_3 = arith.constant 0 : index
    %5 = vector.load %arg3[%c0, %c0_2, %c0_3] : memref<1x4x256xf32, #tpu.memory_space<vmem>>, vector<1x4x256xf32>
    %6 = vector.shape_cast %5 : vector<1x4x256xf32> to vector<4x256xf32>
    %c0_4 = arith.constant 0 : index
    %c0_5 = arith.constant 0 : index
    %c0_6 = arith.constant 0 : index
    %7 = vector.load %arg4[%c0_4, %c0_5, %c0_6] : memref<1x1x256xi32, #tpu.memory_space<vmem>>, vector<1x1x256xi32>
    %8 = vector.shape_cast %7 : vector<1x1x256xi32> to vector<1x256xi32>
    %9 = tpu.iota {dimensions = array<i32: 0>} : vector<4x256xi32>
    %cst = arith.constant dense<0xFF800000> : vector<256xf32>
    %10 = vector.multi_reduction <maximumf>, %6, %cst [0] : vector<4x256xf32> to vector<256xf32>
    %11 = vector.shape_cast %10 : vector<256xf32> to vector<1x256xf32>
    %12 = vector.broadcast %11 : vector<1x256xf32> to vector<4x256xf32>
    %13 = arith.subf %6, %12 : vector<4x256xf32>
    %14 = math.exp %13 : vector<4x256xf32>
    %cst_7 = arith.constant dense<0.000000e+00> : vector<256xf32>
    %15 = vector.multi_reduction <add>, %14, %cst_7 [0] : vector<4x256xf32> to vector<256xf32>
    %16 = vector.shape_cast %15 : vector<256xf32> to vector<1x256xf32>
    %17 = tpu.reciprocal %16 {approx = true} : vector<1x256xf32> -> vector<1x256xf32>
    %18 = vector.broadcast %17 : vector<1x256xf32> to vector<4x256xf32>
    %19 = arith.mulf %14, %18 : vector<4x256xf32>
    %20 = vector.broadcast %8 : vector<1x256xi32> to vector<4x256xi32>
    %21 = arith.cmpi eq, %9, %20 : vector<4x256xi32>
    %c1_i32 = arith.constant 1 : i32
    %22 = arith.muli %arg0, %c1_i32 : i32
    %23 = arith.addi %22, %arg2 : i32
    %c1_i32_8 = arith.constant 1 : i32
    %24 = arith.addi %23, %c1_i32_8 : i32
    %c256_i32 = arith.constant 256 : i32
    %25 = arith.muli %24, %c256_i32 : i32
    %c256_i32_9 = arith.constant 256 : i32
    %26 = arith.cmpi sle, %25, %c256_i32_9 : i32
    %27 = arith.extui %26 : i1 to i32
    %c0_i32_10 = arith.constant 0 : i32
    %28 = arith.cmpi ne, %27, %c0_i32_10 : i32
    scf.if %28 {
      %c0_15 = arith.constant 0 : index
      %c0_16 = arith.constant 0 : index
      %37 = vector.load %arg6[%c0_15, %c0_16] : memref<4x256xf32, #tpu.memory_space<vmem>>, vector<4x256xf32>
      %cst_17 = arith.constant 0.000000e+00 : f32
      %38 = vector.broadcast %cst_17 : f32 to vector<4x256xf32>
      %39 = arith.select %21, %19, %38 : vector<4x256xi1>, vector<4x256xf32>
      %40 = arith.addf %37, %39 : vector<4x256xf32>
      %c0_18 = arith.constant 0 : index
      %c0_19 = arith.constant 0 : index
      %41 = vector.load %arg6[%c0_18, %c0_19] : memref<4x256xf32, #tpu.memory_space<vmem>>, vector<4x256xf32>
      tpu.vector_store %arg6[%c0_18, %c0_19], %40 {strides = array<i32>} : memref<4x256xf32, #tpu.memory_space<vmem>>, vector<4x256xf32>,
      %c0_20 = arith.constant 0 : index
      %c0_21 = arith.constant 0 : index
      %42 = vector.load %arg7[%c0_20, %c0_21] : memref<4x256xf32, #tpu.memory_space<vmem>>, vector<4x256xf32>
      %cst_22 = arith.constant 1.000000e+00 : f32
      %43 = vector.broadcast %cst_22 : f32 to vector<4x256xf32>
      %44 = arith.addf %19, %43 : vector<4x256xf32>
      %45 = arith.select %21, %44, %19 : vector<4x256xi1>, vector<4x256xf32>
      %46 = arith.addf %42, %45 : vector<4x256xf32>
      %c0_23 = arith.constant 0 : index
      %c0_24 = arith.constant 0 : index
      %47 = vector.load %arg7[%c0_23, %c0_24] : memref<4x256xf32, #tpu.memory_space<vmem>>, vector<4x256xf32>
      tpu.vector_store %arg7[%c0_23, %c0_24], %46 {strides = array<i32>} : memref<4x256xf32, #tpu.memory_space<vmem>>, vector<4x256xf32>,
    } else {
    }
    %true = arith.constant true
    %29 = arith.xori %26, %true : i1
    %30 = arith.extui %29 : i1 to i32
    %c0_i32_11 = arith.constant 0 : i32
    %31 = arith.cmpi ne, %30, %c0_i32_11 : i32
    scf.if %31 {
      %37 = tpu.iota {dimensions = array<i32: 1>} : vector<1x256xi32>
      %c256_i32_15 = arith.constant 256 : i32
      %38 = arith.muli %23, %c256_i32_15 : i32
      %39 = vector.broadcast %38 : i32 to vector<1x256xi32>
      %40 = arith.addi %39, %37 : vector<1x256xi32>
      %c256_i32_16 = arith.constant 256 : i32
      %41 = vector.broadcast %c256_i32_16 : i32 to vector<1x256xi32>
      %42 = arith.cmpi slt, %40, %41 : vector<1x256xi32>
      %cst_17 = arith.constant 0.000000e+00 : f32
      %43 = vector.shape_cast %42 : vector<1x256xi1> to vector<1x256xi1>
      %44 = vector.broadcast %43 : vector<1x256xi1> to vector<4x256xi1>
      %45 = vector.broadcast %cst_17 : f32 to vector<4x256xf32>
      %46 = arith.select %44, %19, %45 : vector<4x256xi1>, vector<4x256xf32>
      %47 = vector.broadcast %42 : vector<1x256xi1> to vector<4x256xi1>
      %48 = arith.andi %47, %21 : vector<4x256xi1>
      %c0_18 = arith.constant 0 : index
      %c0_19 = arith.constant 0 : index
      %49 = vector.load %arg6[%c0_18, %c0_19] : memref<4x256xf32, #tpu.memory_space<vmem>>, vector<4x256xf32>
      %cst_20 = arith.constant 0.000000e+00 : f32
      %50 = vector.broadcast %cst_20 : f32 to vector<4x256xf32>
      %51 = arith.select %48, %46, %50 : vector<4x256xi1>, vector<4x256xf32>
      %52 = arith.addf %49, %51 : vector<4x256xf32>
      %c0_21 = arith.constant 0 : index
      %c0_22 = arith.constant 0 : index
      %53 = vector.load %arg6[%c0_21, %c0_22] : memref<4x256xf32, #tpu.memory_space<vmem>>, vector<4x256xf32>
      tpu.vector_store %arg6[%c0_21, %c0_22], %52 {strides = array<i32>} : memref<4x256xf32, #tpu.memory_space<vmem>>, vector<4x256xf32>,
      %c0_23 = arith.constant 0 : index
      %c0_24 = arith.constant 0 : index
      %54 = vector.load %arg7[%c0_23, %c0_24] : memref<4x256xf32, #tpu.memory_space<vmem>>, vector<4x256xf32>
      %cst_25 = arith.constant 1.000000e+00 : f32
      %55 = vector.broadcast %cst_25 : f32 to vector<4x256xf32>
      %56 = arith.addf %46, %55 : vector<4x256xf32>
      %57 = arith.select %48, %56, %46 : vector<4x256xi1>, vector<4x256xf32>
      %58 = arith.addf %54, %57 : vector<4x256xf32>
      %c0_26 = arith.constant 0 : index
      %c0_27 = arith.constant 0 : index
      %59 = vector.load %arg7[%c0_26, %c0_27] : memref<4x256xf32, #tpu.memory_space<vmem>>, vector<4x256xf32>
      tpu.vector_store %arg7[%c0_26, %c0_27], %58 {strides = array<i32>} : memref<4x256xf32, #tpu.memory_space<vmem>>, vector<4x256xf32>,
    } else {
    }
    %c1_i32_12 = arith.constant 1 : i32
    %32 = arith.cmpi eq, %arg1, %c1_i32_12 : i32
    %c0_i32_13 = arith.constant 0 : i32
    %33 = arith.cmpi eq, %arg2, %c0_i32_13 : i32
    %34 = arith.andi %32, %33 : i1
    %35 = arith.extui %34 : i1 to i32
    %c0_i32_14 = arith.constant 0 : i32
    %36 = arith.cmpi ne, %35, %c0_i32_14 : i32
    scf.if %36 {
      %c0_15 = arith.constant 0 : index
      %c0_16 = arith.constant 0 : index
      %37 = vector.load %arg6[%c0_15, %c0_16] : memref<4x256xf32, #tpu.memory_space<vmem>>, vector<4x256xf32>
      %cst_17 = arith.constant dense<0.000000e+00> : vector<4xf32>
      %38 = vector.multi_reduction <add>, %37, %cst_17 [1] : vector<4x256xf32> to vector<4xf32>
      %39 = vector.shape_cast %38 : vector<4xf32> to vector<4x1xf32>
      %c0_18 = arith.constant 0 : index
      %c0_19 = arith.constant 0 : index
      %c0_20 = arith.constant 0 : index
      %40 = vector.load %arg5[%c0_18, %c0_19, %c0_20] : memref<1x4x2xf32, #tpu.memory_space<vmem>>, vector<1x4x1xf32>
      %41 = vector.shape_cast %40 : vector<1x4x1xf32> to vector<4x1xf32>
      %42 = vector.shape_cast %39 : vector<4x1xf32> to vector<1x4x1xf32>
      tpu.vector_store %arg5[%c0_18, %c0_19, %c0_20], %42 {strides = array<i32>} : memref<1x4x2xf32, #tpu.memory_space<vmem>>, vector<1x4x1xf32>,
      %c0_21 = arith.constant 0 : index
      %c0_22 = arith.constant 0 : index
      %43 = vector.load %arg7[%c0_21, %c0_22] : memref<4x256xf32, #tpu.memory_space<vmem>>, vector<4x256xf32>
      %cst_23 = arith.constant dense<0.000000e+00> : vector<4xf32>
      %44 = vector.multi_reduction <add>, %43, %cst_23 [1] : vector<4x256xf32> to vector<4xf32>
      %45 = vector.shape_cast %44 : vector<4xf32> to vector<4x1xf32>
      %c0_24 = arith.constant 0 : index
      %c0_25 = arith.constant 0 : index
      %c1 = arith.constant 1 : index
      %46 = vector.load %arg5[%c0_24, %c0_25, %c1] : memref<1x4x2xf32, #tpu.memory_space<vmem>>, vector<1x4x1xf32>
      %47 = vector.shape_cast %46 : vector<1x4x1xf32> to vector<4x1xf32>
      %48 = vector.shape_cast %45 : vector<4x1xf32> to vector<1x4x1xf32>
      tpu.vector_store %arg5[%c0_24, %c0_25, %c1], %48 {strides = array<i32>} : memref<1x4x2xf32, #tpu.memory_space<vmem>>, vector<1x4x1xf32>,
    } else {
    }
    return
  }
  func.func @transform_0(%arg0: i32, %arg1: i32, %arg2: i32) -> (i32, i32, i32) {
    %c1_i32 = arith.constant 1 : i32
    %0 = arith.muli %arg0, %c1_i32 : i32
    %1 = arith.addi %0, %arg2 : i32
    %c0_i32 = arith.constant 0 : i32
    %2 = arith.minsi %1, %c0_i32 : i32
    %c0_i32_0 = arith.constant 0 : i32
    %c0_i32_1 = arith.constant 0 : i32
    return %arg1, %c0_i32_0, %2 : i32, i32, i32
  }
  func.func @transform_1(%arg0: i32, %arg1: i32, %arg2: i32) -> (i32, i32, i32) {
    %c1_i32 = arith.constant 1 : i32
    %0 = arith.muli %arg0, %c1_i32 : i32
    %1 = arith.addi %0, %arg2 : i32
    %c0_i32 = arith.constant 0 : i32
    %2 = arith.minsi %1, %c0_i32 : i32
    %c0_i32_0 = arith.constant 0 : i32
    %c0_i32_1 = arith.constant 0 : i32
    return %arg1, %c0_i32_0, %2 : i32, i32, i32
  }
  func.func @transform_2(%arg0: i32, %arg1: i32, %arg2: i32) -> (i32, i32, i32) {
    %c0_i32 = arith.constant 0 : i32
    %c0_i32_0 = arith.constant 0 : i32
    %c0_i32_1 = arith.constant 0 : i32
    return %arg0, %c0_i32, %c0_i32_0 : i32, i32, i32
  }
}

</mosaic_0001>

<bundles_post_ra>
// kernel: tpu_custom_call.1
= control target key start
LH: loop header
LB: loop body
LE: loop exit
PB: predicated region body
PF: predicated region fallthrough
CT: control target
= control target key end

     0   :  { %7 = vsyncpa [#allocation5], 0  ;;  %s892_s0 = inlined_call_operand.hbm [shape: f32[2,4,256], index: 0, kind: input, shape index: {}]   ;;  %s893_s1 = inlined_call_operand.hbm [shape: s32[2,1,256], index: 1, kind: input, shape index: {}]   ;;  %s894_s2 = inlined_call_operand.vmem [shape: f32[1,4,2], index: 2, kind: output, shape index: {}]  }
   0x1   :  { %9 = vsyncpa [#allocation5 + $0x1], 0 }
   0x2   :  { %10 = vsyncpa [#allocation7], 0 }
   0x3   :  { %12 = vsyncpa [#allocation7 + $0x1], 0  ;;  %s748_s9 = smov 0   ;;  %s750_s10 = smov 0  }
   0x4   :  { %s752_s11 = smov 0   ;;  %s754_s12 = smov 0  }
   0x5   :  { %s756_s13 = smov 0   ;;  %s758_s14 = smov 0  }
   0x6 LB: > { %s527_s15 = sadd.s32 4294967295, %s728_s14   ;;  %s33_s16 = sadd.s32 1, %s724_s13  ;;  %s728_s14 = sphi %s758_s14, %s18_s14   ;;  %s724_s13 = sphi %s756_s13, %s903_s13   ;;  %s720_s12 = sphi %s754_s12, %s902_s12   ;;  %s716_s11 = sphi %s752_s11, %s901_s11   ;;  %s712_s10 = sphi %s750_s10, %s900_s10   ;;  %s708_s9 = sphi %s748_s9, %s899_s9  }
   0x7   : > { %p35_p0 = scmp.ge.s32.totalorder %s33_s16, 2  ;;  %s52_s17 = sadd.s32 1, %s716_s11 }
   0x8   : > { %p59_p1 = scmp.ne.s32.totalorder %s716_s11, %s712_s10  ;;  %p60_p2 = scmp.eq.s32.totalorder %s728_s14, 0 }
   0x9   : > { %s905_s16 = smov (%p35_p0, %s33_s16), 0  ;;  %p65_p4 = scmp.ne.s32.totalorder %s712_s10, %s708_s9 }
   0xa   : > { %p784_p3 = por %p60_p2, %p59_p1  ;;  %s47_s19 = ssub.s32 %s724_s13, %s905_s16 }
   0xb   : > { %p66_p5 = scmp.eq.s32.totalorder %s527_s15, 0  ;;  %p50_p6 = scmp.eq.s32.totalorder %s47_s19, 0 }
   0xc   : > { %p559_p8 = scmp.lt.s32.totalorder %s728_s14, 2  ;;  %s800_s22 = sand.u32 1, %s716_s11  }
   0xd   : > { %p791_p7 = por %p66_p5, %p65_p4  ;;  %s544_s23 = sshll.u32 %s724_s13, 7 }
   0xe   : > { %s797_s21 = scalar_select %p50_p6, %s716_s11, %s52_s17  }
   0xf   : > { %s530_s24 = sshll.u32 %s800_s22, 3  ;;  %s164_s27 = scalar_lea.hbm %s892_s0, %s544_s23 }
  0x10   : > { %s153_s28 = scalar_lea.vmem [#allocation4], %s530_s24  ;;  %p809_p9 = pnand %p559_p8, %p784_p3 }
  0x11   : > { %s166_s29 = sshll.u32 %s153_s28, 4  ;;  %p536_p10 = scmp.ge.s32.totalorder %s728_s14, 1  ;;  %s167_s29 = int_to_ptr.vmem [resolvable:$true] %s166_s29 }
  0x12   : > { %p195_p11 = scmp.lt.s32.totalorder %s728_s14, 3  ;;  %s150_s3 = scalar_lea.sflag [#allocation5], %s800_s22 }
  0x13   : > { %p620_p12 = pneg %p809_p9  ;;  %s631_s4 = scalar_lea.vmem %s167_s29, 128 }
  0x14   : > { %p632_p13 = scmp.ne.s32.totalorder %s167_s29, %s631_s4  ;;  %s730_s5 = smov [#allocation4]  }
  0x15   : > { %s636_s6 = sshll.u32 %s730_s5, 4  ;;  %s637_s6 = int_to_ptr.vmem [resolvable:$false] %s636_s6 }
  0x16   : > { %p634_p0 = pnand %p632_p13, %p620_p12  ;;  %s638_s7 = scalar_lea.vmem %s637_s6, 256 }
  0x17   : > { %p639_p2 = scmp.lt.s32.totalorder %s167_s29, %s637_s6  ;;  %p640_p3 = scmp.lt.s32.totalorder %s638_s7, %s631_s4 }
  0x18   : > { %p635_p1 = pneg %p634_p0 }
  0x19   : > { %p641_p4 = por %p640_p3, %p639_p2 }
  0x1b   : > { %p642_p5 = pnand %p641_p4, %p635_p1 }
  0x1d   : > { %645 = shalt.err (!%p642_p5)
}
  0x1e   : > { %555 = dma.hbm_to_vmem [thread:$0]  (!%p809_p9), %s164_s27, 128, %s167_s29, %s150_s3  }
  0x1f   : > { %p827_p6 = pnand %p536_p10, %p195_p11  ;;  %s533_s9 = sshll.u32 %s800_s22, 1 }
  0x20   : > { %s545_s15 = sshll.u32 %s724_s13, 5  ;;  %s177_s23 = scalar_lea.vmem [#allocation6], %s533_s9 }
  0x21   : > { %s188_s19 = scalar_lea.hbm %s893_s1, %s545_s15  ;;  %s190_s24 = sshll.u32 %s177_s23, 4  ;;  %s191_s24 = int_to_ptr.vmem [resolvable:$true] %s190_s24 }
  0x22   : > { %s174_s25 = scalar_lea.sflag [#allocation7], %s800_s22  ;;  %s659_s26 = scalar_lea.vmem %s191_s24, 32 }
  0x23   : > { %p660_p8 = scmp.ne.s32.totalorder %s191_s24, %s659_s26  ;;  %s731_s27 = smov [#allocation6]  }
  0x24   : > { %s664_s28 = sshll.u32 %s731_s27, 4  ;;  %s665_s28 = int_to_ptr.vmem [resolvable:$false] %s664_s28 }
  0x25   : > { %p662_p13 = pnand %p660_p8, %p620_p12  ;;  %s666_s29 = scalar_lea.vmem %s665_s28, 64 }
  0x26   : > { %p667_p10 = scmp.lt.s32.totalorder %s191_s24, %s665_s28  ;;  %p668_p11 = scmp.lt.s32.totalorder %s666_s29, %s659_s26 }
  0x27   : > { %p663_p0 = pneg %p662_p13 }
  0x28   : > { %p669_p1 = por %p668_p11, %p667_p10 }
  0x2a   : > { %p670_p2 = pnand %p669_p1, %p663_p0 }
  0x2c   : > { %673 = shalt.err (!%p670_p2)
}
  0x2d   : > { %558 = dma.hbm_to_vmem [thread:$0]  (!%p809_p9), %s188_s19, 32, %s191_s24, %s174_s25  }
  0x2e   : > { %199 = sbr.rel (%p827_p6) target bundleno = 294 (0x126), region = 28  ;;  %s201_s22 = sand.u32 (!%p827_p6), 1, %s712_s10  }
  0x2f   : > { %s537_s3 = sshll.u32 (!%p827_p6), %s201_s22, 3  ;;  %s202_s4 = scalar_lea.sflag (!%p827_p6), [#allocation5], %s201_s22 }
  0x30   : > { %s205_s5 = scalar_lea.vmem (!%p827_p6), [#allocation4], %s537_s3 }
  0x33   : > { %699 = dma.done.wait (%p791_p7), %s202_s4, 128  }
  0x34   : > { %701 = vsyncadd (%p791_p7), %s202_s4, 4294967168  ;;  %s538_s6 = sshll.u32 %s201_s22, 1  ;;  %s211_s7 = scalar_lea.sflag [#allocation7], %s201_s22 }
  0x35   : > { %s849_s9 = scalar_lea.vmem [#allocation6], %s538_s6 }
  0x36   : > { %703 = dma.done.wait (%p791_p7), %s211_s7, 32  }
  0x37   : > { %705 = vsyncadd (%p791_p7), %s211_s7, 4294967264  ;;  %p251_p9 = scmp.eq.s32.totalorder %s720_s12, 0 }
  0x38   : > { %v732_v0 = vmov (%p251_p9), 0.0  }
  0x39   : > { %256 = sbr.rel (!%p251_p9) target bundleno = 62 (0x3e), region = 40  ;;  %257 = vst [vmem:[#allocation2] sm:$0xff] (%p251_p9), %v732_v0  ;;  %258 = vst [vmem:[#allocation3] sm:$0xff] (%p251_p9), %v732_v0 }
  0x3e PF: > { %v259_v1 = vld [vmem:[%s205_s5] sm:$0xff]  ;;  %vm266_vm0 = vcmask 1043456   ;;  %p398_p12 = scmp.eq.s32.totalorder %s720_s12, 1  ;;  %v261_v36 = vlaneseq  ;;  %v260_v39 = vld [vmem:[%s849_s9] sm:$0x3] }
  0x3f   : > { %v264_v2 = vcombine.high %v259_v1, %v259_v1  ;;  %v267_v3 = vsel %vm266_vm0, %v259_v1, -inf  ;;  %vm412_vm3 = vcmask (%p398_p12), 3072   ;;  %vm423_vm4 = vcmask (%p398_p12), 11272  }
  0x40   : > { %v268_v4 = vrot.slane %v267_v3, 4  ;;  %v262_v37 = vshrl.u32 %v261_v36, 7  ;;  %v329_v50 = vld [vmem:[#allocation2] sm:$0xff]  ;;  %v341_v55 = vld [vmem:[#allocation3] sm:$0xff] }
  0x41   : > { %v274_v5 = vsel %vm266_vm0, %v264_v2, -inf }
  0x42   : > { %v269_v6 = vmax.f32 %v267_v3, %v268_v4  ;;  %v275_v7 = vrot.slane %v274_v5, 4  ;;  %v314_v38 = vsub.s32 0, %v262_v37  ;;  %v318_v40 = vsub.s32 1, %v262_v37 }
  0x44   : > { %v270_v8 = vrot.slane %v269_v6, 2  ;;  %v276_v9 = vmax.f32 %v274_v5, %v275_v7  ;;  %v315_v42 = vrot.slane %v260_v39, %v314_v38  ;;  %v319_v44 = vrot.slane %v260_v39, %v318_v40 }
  0x46   : > { %v271_v10 = vmax.f32 %v269_v6, %v270_v8  ;;  %v277_v11 = vrot.slane %v276_v9, 2  ;;  %vm320_vm1 = vcmp.eq.s32.totalorder %v262_v37, %v315_v42  ;;  %vm321_vm2 = vcmp.eq.s32.totalorder %v262_v37, %v319_v44 }
  0x48   : > { %v272_v12 = vrot.slane %v271_v10, 1  ;;  %v278_v13 = vmax.f32 %v276_v9, %v277_v11 }
  0x4a   : > { %v273_v14 = vmax.f32 %v271_v10, %v272_v12  ;;  %v279_v15 = vrot.slane %v278_v13, 1 }
  0x4c   : > { %v280_v16 = vmax.f32 %v278_v13, %v279_v15 }
  0x4e   : > { %v283_v17 = vcombine.low %v273_v14, %v280_v16 }
  0x50   : > { %v285_v18 = vsub.f32 %v259_v1, %v283_v17 }
  0x52   : > { %v286_v19 = vmul.f32 1.442695, %v285_v18 }
  0x54   : > { %610 = vpow2.f32 %v286_v19 }
  0x61   : > { %v611_v20 = vpop.eup %610 }
  0x62   : > { %v289_v21 = vcombine.high %v611_v20, %v611_v20  ;;  %v291_v22 = vsel %vm266_vm0, %v611_v20, 0.0 }
  0x63   : > { %v292_v23 = vrot.slane %v291_v22, 4 }
  0x64   : > { %v298_v24 = vsel %vm266_vm0, %v289_v21, 0.0 }
  0x65   : > { %v293_v25 = vadd.f32 %v292_v23, %v291_v22  ;;  %v299_v26 = vrot.slane %v298_v24, 4 }
  0x67   : > { %v294_v27 = vrot.slane %v293_v25, 2  ;;  %v300_v28 = vadd.f32 %v299_v26, %v298_v24 }
  0x69   : > { %v295_v29 = vadd.f32 %v294_v27, %v293_v25  ;;  %v301_v30 = vrot.slane %v300_v28, 2 }
  0x6b   : > { %v296_v31 = vrot.slane %v295_v29, 1  ;;  %v302_v32 = vadd.f32 %v301_v30, %v300_v28 }
  0x6d   : > { %v297_v33 = vadd.f32 %v296_v31, %v295_v29  ;;  %v303_v34 = vrot.slane %v302_v32, 1 }
  0x6f   : > { %v304_v35 = vadd.f32 %v303_v34, %v302_v32  ;;  %612 = vrcp.f32 %v297_v33 }
  0x71   : > { %614 = vrcp.f32 %v304_v35 }
  0x7c   : > { %v613_v41 = vpop.eup %612 }
  0x7e   : > { %v615_v43 = vpop.eup %614 }
  0x7f   : > { %v309_v45 = vcombine.low %v613_v41, %v615_v43 }
  0x81   : > { %v311_v46 = vmul.f32 %v611_v20, %v309_v45 }
  0x83   : > { %v331_v47 = vcombine.high %v311_v46, %v311_v46  ;;  %v333_v48 = vsel %vm320_vm1, %v311_v46, 0.0  ;;  %v342_v49 = vadd.f32 1.0, %v311_v46 }
  0x85   : > { %v334_v51 = vsel %vm321_vm2, %v331_v47, 0.0  ;;  %v344_v52 = vcombine.high %v342_v49, %v342_v49  ;;  %v346_v53 = vsel %vm320_vm1, %v342_v49, %v311_v46 }
  0x86   : > { %v337_v54 = vcombine.low %v333_v48, %v334_v51 }
  0x87   : > { %v347_v56 = vsel %vm321_vm2, %v344_v52, %v331_v47 }
  0x88   : > { %v339_v57 = vadd.f32 %v337_v54, %v329_v50  ;;  %v350_v58 = vcombine.low %v346_v53, %v347_v56  ;;  %402 = sbr.rel (!%p398_p12) target bundleno = 294 (0x126), region = 52 }
  0x8a   : > { %340 = vst [vmem:[#allocation2] sm:$0xff] %v339_v57  ;;  %v352_v59 = vadd.f32 %v350_v58, %v341_v55 }
  0x8c   : > { %353 = vst [vmem:[#allocation3] sm:$0xff] %v352_v59 }
  0x91   : > { %v403_v60 = vld [vmem:[#allocation2] sm:$0xff] }
  0x92   : > { %v405_v62 = vcombine.high %v403_v60, %v403_v60  ;;  %v407_v63 = vsel %vm266_vm0, %v403_v60, 0.0 }
  0x93   : > { %v414_v61 = vld [vmem:[#allocation3] sm:$0xff] }
  0x94   : > { %v416_v0 = vcombine.high %v414_v61, %v414_v61  ;;  %v408_v1 = vsel %vm266_vm0, %v405_v62, 0.0  ;;  %v418_v2 = vsel %vm266_vm0, %v414_v61, 0.0 }
  0x95   : > { %v409_v4 = vadd.f32 %v408_v1, %v407_v63 }
  0x96   : > { %v419_v3 = vsel %vm266_vm0, %v416_v0, 0.0 }
  0x97   : > { %410 = vadd.xlane.f32.xlu0 %v409_v4  ;;  %v420_v5 = vadd.f32 %v419_v3, %v418_v2 }
  0x9b   : > { %421 = vadd.xlane.f32.xlu0 %v420_v5 }
 0x120   : > { %v411_v6 = vpop.xlane.xlu0 %410 }
 0x121   : > { %413 = vst.msk [vmem:[%s894_s2] sm:$0xf] %vm412_vm3, %v411_v6 }
 0x124   : > { %v422_v7 = vpop.xlane.xlu0 %421 }
 0x125   : > { %424 = vst.msk [vmem:[%s894_s2] sm:$0xf] %vm423_vm4, %v422_v7 }
 0x126 PF: > { %s18_s14 = sadd.s32 1, %s728_s14   ;;  %s899_s9 = smov %s712_s10 }
 0x127   : > { %p15_p7 = scmp.ge.s32.totalorder %s18_s14, 4   ;;  %s900_s10 = smov %s716_s11 }
 0x128   : > { %s901_s11 = smov %s797_s21  ;;  %s902_s12 = smov %s724_s13 }
 0x129   : > { %s903_s13 = smov %s905_s16  ;;  %17 = sbr.rel (!%p15_p7) target bundleno = 6 (0x6), region = 97 }
 0x12e   :  { %444 = vsyncpa [#allocation5], 1 }
 0x12f   :  { %446 = vsyncpa [#allocation5 + $0x1], 1 }
 0x130   :  { %447 = vsyncpa [#allocation7], 1 }
 0x131   :  { %449 = vsyncpa [#allocation7 + $0x1], 1 }

</bundles_post_ra>
